<compile_context>
chip_gen: v6e
topology: v6e:2x2x1
jax: 0.10.0
libtpu: 0.0.40
codegen_flags: <defaults>
</compile_context>

<pallas_src>
import jax
import jax.numpy as jnp
from jax.experimental import pallas as pl
from jax.experimental.pallas import tpu as pltpu


def _simple_loss_kernel(cv_ref, row_ref, col_ref, sel_ref, agg_ref, dist_ref,
                        out_ref):
    """One grid step == one block of Bb batch elements.

    cv_ref   : (Bb, T*H, W) f32 VMEM  cost volume, rows indexed by t*H + y
    row_ref  : (Bb, N*T, 1) i32 VMEM  row index (t*H + y) per (traj, time)
    col_ref  : (Bb, N*T, 1) i32 VMEM  column index (x) per (traj, time)
    sel_ref  : (N*T, N*T)   f32 VMEM  constant: replicate last trajectory's
                                      gathered values to every (traj, time)
    agg_ref  : (N, N*T)     f32 VMEM  constant: sum over the time axis
    dist_ref : (1, 1)       f32 SMEM  scalar margin ("distance")
    out_ref  : (1, 1, Bb)   f32 VMEM  per-batch partial losses for this block
    """
    Bb, TH, W = cv_ref.shape
    NT = row_ref.shape[1]

    margin = dist_ref[0, 0]
    sel = sel_ref[...]          # (NT, NT)
    agg = agg_ref[...]          # (N,  NT)

    # Hoisted out of the per-batch loop (JAX does not CSE broadcasts/iotas).
    r_iota = jax.lax.broadcasted_iota(jnp.int32, (NT, TH), 1)
    c_iota = jax.lax.broadcasted_iota(jnp.int32, (NT, W), 1)
    lane = jax.lax.broadcasted_iota(jnp.int32, (1, 1, Bb), 2)

    acc = jnp.zeros((1, 1, Bb), jnp.float32)
    for i in range(Bb):  # static unroll over the small batch block
        cv_i = cv_ref[i]        # (TH, W)
        row_i = row_ref[i]      # (NT, 1) int32
        col_i = col_ref[i]      # (NT, 1) int32

        # Stage 1: gather whole rows via an MXU matmul whose LHS is a fused
        # one-hot (compare -> cast -> dot; no materialized jnp.where tensor).
        row_oh = (r_iota == row_i).astype(jnp.float32)                    # (NT, TH)
        rows = jnp.dot(row_oh, cv_i, preferred_element_type=jnp.float32)  # (NT, W)

        # Stage 2: pick the x column out of each gathered row (W is small).
        col_oh = (c_iota == col_i).astype(jnp.float32)                    # (NT, W)
        cv1 = jnp.sum(rows * col_oh, axis=1, keepdims=True)               # (NT, 1)

        # cv2 = last-trajectory values replicated across trajectories (MXU).
        cv2 = jnp.dot(sel, cv1, preferred_element_type=jnp.float32)       # (NT, 1)

        hinge = jnp.maximum(cv2 - cv1 + margin, 0.0)                      # (NT, 1)
        # Sum over time per trajectory, again as an MXU matvec.
        per_traj = jnp.dot(agg, hinge, preferred_element_type=jnp.float32)  # (N, 1)
        loss_i = jnp.max(per_traj)                                        # scalar

        acc = acc + loss_i * (lane == i).astype(jnp.float32)

    out_ref[...] = acc


def simple_loss_forward(cost_volume, negative_trajectory, distance, block_b=8):
    """JAX wrapper reproducing SimpleLoss.forward."""
    B, T, H, W = cost_volume.shape
    _, N, T2, _ = negative_trajectory.shape
    assert T2 == T, "trajectory length must match cost-volume time axis"
    TH = T * H
    NT = N * T

    Bb = min(block_b, B)                 # batch elements per grid step
    nb = -(-B // Bb)                     # number of grid steps
    Bpad = nb * Bb

    nt = negative_trajectory.astype(jnp.int32)           # .long() in torch
    row_idx = (nt[..., 0] * H + nt[..., 1]).reshape(B, NT, 1)   # t*H + y
    col_idx = nt[..., 2].reshape(B, NT, 1)                      # x
    cv = cost_volume.reshape(B, TH, W).astype(jnp.float32)

    if Bpad != B:                        # pad batch; padded losses dropped below
        pad = Bpad - B
        cv = jnp.pad(cv, ((0, pad), (0, 0), (0, 0)))
        row_idx = jnp.pad(row_idx, ((0, pad), (0, 0), (0, 0)))
        col_idx = jnp.pad(col_idx, ((0, pad), (0, 0), (0, 0)))

    # Constant regrouping matrices (depend only on N, T), built once here so the
    # kernel needs no in-kernel integer div/mod.
    k = jnp.arange(NT)
    sel = (k[None, :] == (NT - T) + (k[:, None] % T)).astype(jnp.float32)  # (NT, NT)
    agg = (k[None, :] // T == jnp.arange(N)[:, None]).astype(jnp.float32)  # (N, NT)

    dist = jnp.asarray(distance, dtype=jnp.float32).reshape(1, 1)

    out = pl.pallas_call(
        _simple_loss_kernel,
        out_shape=jax.ShapeDtypeStruct((nb, 1, Bb), jnp.float32),
        grid_spec=pltpu.PrefetchScalarGridSpec(
            num_scalar_prefetch=0,
            grid=(nb,),
            in_specs=[
                pl.BlockSpec((Bb, TH, W), lambda i: (i, 0, 0)),
                pl.BlockSpec((Bb, NT, 1), lambda i: (i, 0, 0)),
                pl.BlockSpec((Bb, NT, 1), lambda i: (i, 0, 0)),
                pl.BlockSpec((NT, NT), lambda i: (0, 0)),
                pl.BlockSpec((N, NT), lambda i: (0, 0)),
                pl.BlockSpec(memory_space=pltpu.MemorySpace.SMEM),
            ],
            out_specs=pl.BlockSpec((1, 1, Bb), lambda i: (i, 0, 0)),
        ),
        compiler_params=pltpu.CompilerParams(
            dimension_semantics=("parallel",),      # independent per batch block
            vmem_limit_bytes=32 * 1024 * 1024,
        ),
    )(cv, row_idx, col_idx, sel, agg, dist)

    # Per-batch partials (block-major order matches global batch order);
    # drop padded entries and reduce over batch here.
    return jnp.sum(out.reshape(-1)[:B])


def _reference_forward(cost_volume, negative_trajectory, distance):
    """Pure-JAX reference mirroring the PyTorch forward."""
    nt = negative_trajectory.astype(jnp.int32)
    B = cost_volume.shape[0]
    bidx = jnp.arange(B)[:, None, None]
    cv1 = cost_volume[bidx, nt[..., 0], nt[..., 1], nt[..., 2]]  # (B, N, T)
    cv2 = cv1[:, -1:, :]                                         # (B, 1, T)
    hinge = jnp.maximum(cv2 - cv1 + distance, 0.0)
    return jnp.sum(jnp.max(jnp.sum(hinge, axis=2), axis=1))


if __name__ == "__main__":
    key = jax.random.PRNGKey(0)
    B, T, H, W, N = 2, 8, 16, 16, 8
    k_cv, k_y, k_x = jax.random.split(key, 3)

    cost_volume = jax.random.normal(k_cv, (B, T, H, W), dtype=jnp.float32)
    t_idx = jnp.broadcast_to(
        jnp.arange(T, dtype=jnp.int32)[None, None, :], (B, N, T))
    y_idx = jax.random.randint(k_y, (B, N, T), 0, H, dtype=jnp.int32)
    x_idx = jax.random.randint(k_x, (B, N, T), 0, W, dtype=jnp.int32)
    negative_trajectory = jnp.stack([t_idx, y_idx, x_idx], axis=-1)  # (B, N, T, 3)
    distance = jnp.float32(0.5)

    loss = jax.block_until_ready(
        simple_loss_forward(cost_volume, negative_trajectory, distance))
    ref = _reference_forward(cost_volume, negative_trajectory, distance)
    assert jnp.allclose(loss, ref, rtol=1e-5, atol=1e-5), (loss, ref)
    print("KERNEL_OK")
</pallas_src>

<mosaic_0001>
module attributes {stable_mosaic.version = 11 : i64} {
  func.func @_simple_loss_kernel(%arg0: i32, %arg1: memref<2x128x16xf32, #tpu.memory_space<vmem>>, %arg2: memref<2x64x1xi32, #tpu.memory_space<vmem>>, %arg3: memref<2x64x1xi32, #tpu.memory_space<vmem>>, %arg4: memref<64x64xf32, #tpu.memory_space<vmem>>, %arg5: memref<8x64xf32, #tpu.memory_space<vmem>>, %arg6: memref<1x1xf32, #tpu.memory_space<smem>>, %arg7: memref<1x1x2xf32, #tpu.memory_space<vmem>>) attributes {dimension_semantics = [#tpu.dimension_semantics<parallel>], iteration_bounds = array<i64: 1>, scalar_prefetch = 0 : i64, scratch_operands = 0 : i64, tpu.core_type = #tpu.core_type<tc>, window_params = [{transform_indices = @transform_0, window_bounds = array<i64: 2, 128, 16>}, {transform_indices = @transform_1, window_bounds = array<i64: 2, 64, 1>}, {transform_indices = @transform_2, window_bounds = array<i64: 2, 64, 1>}, {pipeline_mode = #tpu.pipeline_mode<synchronous>, transform_indices = @transform_3, window_bounds = array<i64: 64, 64>}, {pipeline_mode = #tpu.pipeline_mode<synchronous>, transform_indices = @transform_4, window_bounds = array<i64: 8, 64>}, {transform_indices = @transform_5, window_bounds = array<i64: 1, 1>}, {transform_indices = @transform_6, window_bounds = array<i64: 1, 1, 2>}]} {
    %c0 = arith.constant 0 : index
    %c0_0 = arith.constant 0 : index
    %0 = memref.load %arg6[%c0, %c0_0] : memref<1x1xf32, #tpu.memory_space<smem>>
    %c0_1 = arith.constant 0 : index
    %c0_2 = arith.constant 0 : index
    %1 = vector.load %arg4[%c0_1, %c0_2] : memref<64x64xf32, #tpu.memory_space<vmem>>, vector<64x64xf32>
    %c0_3 = arith.constant 0 : index
    %c0_4 = arith.constant 0 : index
    %2 = vector.load %arg5[%c0_3, %c0_4] : memref<8x64xf32, #tpu.memory_space<vmem>>, vector<8x64xf32>
    %3 = tpu.iota {dimensions = array<i32: 1>} : vector<64x128xi32>
    %4 = tpu.iota {dimensions = array<i32: 1>} : vector<64x16xi32>
    %5 = tpu.iota {dimensions = array<i32: 2>} : vector<1x1x2xi32>
    %cst = arith.constant 0.000000e+00 : f32
    %6 = vector.broadcast %cst : f32 to vector<1x1x2xf32>
    %c0_5 = arith.constant 0 : index
    %c0_6 = arith.constant 0 : index
    %c0_7 = arith.constant 0 : index
    %7 = vector.load %arg1[%c0_5, %c0_6, %c0_7] : memref<2x128x16xf32, #tpu.memory_space<vmem>>, vector<1x128x16xf32>
    %8 = vector.shape_cast %7 : vector<1x128x16xf32> to vector<128x16xf32>
    %c0_8 = arith.constant 0 : index
    %c0_9 = arith.constant 0 : index
    %c0_10 = arith.constant 0 : index
    %9 = vector.load %arg2[%c0_8, %c0_9, %c0_10] : memref<2x64x1xi32, #tpu.memory_space<vmem>>, vector<1x64x1xi32>
    %10 = vector.shape_cast %9 : vector<1x64x1xi32> to vector<64x1xi32>
    %c0_11 = arith.constant 0 : index
    %c0_12 = arith.constant 0 : index
    %c0_13 = arith.constant 0 : index
    %11 = vector.load %arg3[%c0_11, %c0_12, %c0_13] : memref<2x64x1xi32, #tpu.memory_space<vmem>>, vector<1x64x1xi32>
    %12 = vector.shape_cast %11 : vector<1x64x1xi32> to vector<64x1xi32>
    %13 = vector.broadcast %10 : vector<64x1xi32> to vector<64x128xi32>
    %14 = arith.cmpi eq, %3, %13 : vector<64x128xi32>
    %15 = arith.extui %14 : vector<64x128xi1> to vector<64x128xi32>
    %16 = arith.sitofp %15 : vector<64x128xi32> to vector<64x128xf32>
    %cst_14 = arith.constant dense<0.000000e+00> : vector<64x16xf32>
    %17 = tpu.matmul %16, %8, %cst_14 {dimension_numbers = #tpu.dot_dimension_numbers<[1], [0], [0], [1], [0, 0, 1, 1], [], []>} : vector<64x128xf32>, vector<128x16xf32>, vector<64x16xf32> -> vector<64x16xf32>
    %18 = vector.broadcast %12 : vector<64x1xi32> to vector<64x16xi32>
    %19 = arith.cmpi eq, %4, %18 : vector<64x16xi32>
    %20 = arith.extui %19 : vector<64x16xi1> to vector<64x16xi32>
    %21 = arith.sitofp %20 : vector<64x16xi32> to vector<64x16xf32>
    %22 = arith.mulf %17, %21 : vector<64x16xf32>
    %cst_15 = arith.constant dense<0.000000e+00> : vector<64xf32>
    %23 = vector.multi_reduction <add>, %22, %cst_15 [1] : vector<64x16xf32> to vector<64xf32>
    %24 = vector.shape_cast %23 : vector<64xf32> to vector<64x1xf32>
    %cst_16 = arith.constant dense<0.000000e+00> : vector<64x1xf32>
    %25 = tpu.matmul %1, %24, %cst_16 {dimension_numbers = #tpu.dot_dimension_numbers<[1], [0], [0], [1], [0, 0, 1, 1], [], []>} : vector<64x64xf32>, vector<64x1xf32>, vector<64x1xf32> -> vector<64x1xf32>
    %26 = arith.subf %25, %24 : vector<64x1xf32>
    %27 = vector.broadcast %0 : f32 to vector<64x1xf32>
    %28 = arith.addf %26, %27 : vector<64x1xf32>
    %cst_17 = arith.constant 0.000000e+00 : f32
    %29 = vector.broadcast %cst_17 : f32 to vector<64x1xf32>
    %30 = arith.maximumf %28, %29 : vector<64x1xf32>
    %cst_18 = arith.constant dense<0.000000e+00> : vector<8x1xf32>
    %31 = tpu.matmul %2, %30, %cst_18 {dimension_numbers = #tpu.dot_dimension_numbers<[1], [0], [0], [1], [0, 0, 1, 1], [], []>} : vector<8x64xf32>, vector<64x1xf32>, vector<8x1xf32> -> vector<8x1xf32>
    %32 = vector.shape_cast %31 : vector<8x1xf32> to vector<1x8x1xf32>
    %cst_19 = arith.constant dense<0xFF800000> : vector<1xf32>
    %33 = vector.multi_reduction <maximumf>, %32, %cst_19 [1, 2] : vector<1x8x1xf32> to vector<1xf32>
    %34 = vector.shape_cast %33 : vector<1xf32> to vector<1x1x1xf32>
    %35 = vector.extract %34[0, 0, 0] : f32 from vector<1x1x1xf32>
    %c0_i32 = arith.constant 0 : i32
    %36 = vector.broadcast %c0_i32 : i32 to vector<1x1x2xi32>
    %37 = arith.cmpi eq, %5, %36 : vector<1x1x2xi32>
    %38 = arith.extui %37 : vector<1x1x2xi1> to vector<1x1x2xi32>
    %39 = arith.sitofp %38 : vector<1x1x2xi32> to vector<1x1x2xf32>
    %40 = vector.broadcast %35 : f32 to vector<1x1x2xf32>
    %41 = arith.mulf %40, %39 : vector<1x1x2xf32>
    %42 = arith.addf %6, %41 : vector<1x1x2xf32>
    %c1 = arith.constant 1 : index
    %c0_20 = arith.constant 0 : index
    %c0_21 = arith.constant 0 : index
    %43 = vector.load %arg1[%c1, %c0_20, %c0_21] : memref<2x128x16xf32, #tpu.memory_space<vmem>>, vector<1x128x16xf32>
    %44 = vector.shape_cast %43 : vector<1x128x16xf32> to vector<128x16xf32>
    %c1_22 = arith.constant 1 : index
    %c0_23 = arith.constant 0 : index
    %c0_24 = arith.constant 0 : index
    %45 = vector.load %arg2[%c1_22, %c0_23, %c0_24] : memref<2x64x1xi32, #tpu.memory_space<vmem>>, vector<1x64x1xi32>
    %46 = vector.shape_cast %45 : vector<1x64x1xi32> to vector<64x1xi32>
    %c1_25 = arith.constant 1 : index
    %c0_26 = arith.constant 0 : index
    %c0_27 = arith.constant 0 : index
    %47 = vector.load %arg3[%c1_25, %c0_26, %c0_27] : memref<2x64x1xi32, #tpu.memory_space<vmem>>, vector<1x64x1xi32>
    %48 = vector.shape_cast %47 : vector<1x64x1xi32> to vector<64x1xi32>
    %49 = vector.broadcast %46 : vector<64x1xi32> to vector<64x128xi32>
    %50 = arith.cmpi eq, %3, %49 : vector<64x128xi32>
    %51 = arith.extui %50 : vector<64x128xi1> to vector<64x128xi32>
    %52 = arith.sitofp %51 : vector<64x128xi32> to vector<64x128xf32>
    %cst_28 = arith.constant dense<0.000000e+00> : vector<64x16xf32>
    %53 = tpu.matmul %52, %44, %cst_28 {dimension_numbers = #tpu.dot_dimension_numbers<[1], [0], [0], [1], [0, 0, 1, 1], [], []>} : vector<64x128xf32>, vector<128x16xf32>, vector<64x16xf32> -> vector<64x16xf32>
    %54 = vector.broadcast %48 : vector<64x1xi32> to vector<64x16xi32>
    %55 = arith.cmpi eq, %4, %54 : vector<64x16xi32>
    %56 = arith.extui %55 : vector<64x16xi1> to vector<64x16xi32>
    %57 = arith.sitofp %56 : vector<64x16xi32> to vector<64x16xf32>
    %58 = arith.mulf %53, %57 : vector<64x16xf32>
    %cst_29 = arith.constant dense<0.000000e+00> : vector<64xf32>
    %59 = vector.multi_reduction <add>, %58, %cst_29 [1] : vector<64x16xf32> to vector<64xf32>
    %60 = vector.shape_cast %59 : vector<64xf32> to vector<64x1xf32>
    %cst_30 = arith.constant dense<0.000000e+00> : vector<64x1xf32>
    %61 = tpu.matmul %1, %60, %cst_30 {dimension_numbers = #tpu.dot_dimension_numbers<[1], [0], [0], [1], [0, 0, 1, 1], [], []>} : vector<64x64xf32>, vector<64x1xf32>, vector<64x1xf32> -> vector<64x1xf32>
    %62 = arith.subf %61, %60 : vector<64x1xf32>
    %63 = vector.broadcast %0 : f32 to vector<64x1xf32>
    %64 = arith.addf %62, %63 : vector<64x1xf32>
    %cst_31 = arith.constant 0.000000e+00 : f32
    %65 = vector.broadcast %cst_31 : f32 to vector<64x1xf32>
    %66 = arith.maximumf %64, %65 : vector<64x1xf32>
    %cst_32 = arith.constant dense<0.000000e+00> : vector<8x1xf32>
    %67 = tpu.matmul %2, %66, %cst_32 {dimension_numbers = #tpu.dot_dimension_numbers<[1], [0], [0], [1], [0, 0, 1, 1], [], []>} : vector<8x64xf32>, vector<64x1xf32>, vector<8x1xf32> -> vector<8x1xf32>
    %68 = vector.shape_cast %67 : vector<8x1xf32> to vector<1x8x1xf32>
    %cst_33 = arith.constant dense<0xFF800000> : vector<1xf32>
    %69 = vector.multi_reduction <maximumf>, %68, %cst_33 [1, 2] : vector<1x8x1xf32> to vector<1xf32>
    %70 = vector.shape_cast %69 : vector<1xf32> to vector<1x1x1xf32>
    %71 = vector.extract %70[0, 0, 0] : f32 from vector<1x1x1xf32>
    %c1_i32 = arith.constant 1 : i32
    %72 = vector.broadcast %c1_i32 : i32 to vector<1x1x2xi32>
    %73 = arith.cmpi eq, %5, %72 : vector<1x1x2xi32>
    %74 = arith.extui %73 : vector<1x1x2xi1> to vector<1x1x2xi32>
    %75 = arith.sitofp %74 : vector<1x1x2xi32> to vector<1x1x2xf32>
    %76 = vector.broadcast %71 : f32 to vector<1x1x2xf32>
    %77 = arith.mulf %76, %75 : vector<1x1x2xf32>
    %78 = arith.addf %42, %77 : vector<1x1x2xf32>
    %c0_34 = arith.constant 0 : index
    %c0_35 = arith.constant 0 : index
    %c0_36 = arith.constant 0 : index
    %79 = vector.load %arg7[%c0_34, %c0_35, %c0_36] : memref<1x1x2xf32, #tpu.memory_space<vmem>>, vector<1x1x2xf32>
    tpu.vector_store %arg7[%c0_34, %c0_35, %c0_36], %78 {strides = array<i32>} : memref<1x1x2xf32, #tpu.memory_space<vmem>>, vector<1x1x2xf32>,
    return
  }
  func.func @transform_0(%arg0: i32) -> (i32, i32, i32) {
    %c0_i32 = arith.constant 0 : i32
    %c0_i32_0 = arith.constant 0 : i32
    %c0_i32_1 = arith.constant 0 : i32
    return %arg0, %c0_i32, %c0_i32_0 : i32, i32, i32
  }
  func.func @transform_1(%arg0: i32) -> (i32, i32, i32) {
    %c0_i32 = arith.constant 0 : i32
    %c0_i32_0 = arith.constant 0 : i32
    %c0_i32_1 = arith.constant 0 : i32
    return %arg0, %c0_i32, %c0_i32_0 : i32, i32, i32
  }
  func.func @transform_2(%arg0: i32) -> (i32, i32, i32) {
    %c0_i32 = arith.constant 0 : i32
    %c0_i32_0 = arith.constant 0 : i32
    %c0_i32_1 = arith.constant 0 : i32
    return %arg0, %c0_i32, %c0_i32_0 : i32, i32, i32
  }
  func.func @transform_3(%arg0: i32) -> (i32, i32) {
    %c0_i32 = arith.constant 0 : i32
    %c0_i32_0 = arith.constant 0 : i32
    %c0_i32_1 = arith.constant 0 : i32
    return %c0_i32, %c0_i32_0 : i32, i32
  }
  func.func @transform_4(%arg0: i32) -> (i32, i32) {
    %c0_i32 = arith.constant 0 : i32
    %c0_i32_0 = arith.constant 0 : i32
    %c0_i32_1 = arith.constant 0 : i32
    return %c0_i32, %c0_i32_0 : i32, i32
  }
  func.func @transform_5(%arg0: i32) -> (i32, i32) {
    %c0_i32 = arith.constant 0 : i32
    %c0_i32_0 = arith.constant 0 : i32
    %c0_i32_1 = arith.constant 0 : i32
    return %c0_i32, %c0_i32_0 : i32, i32
  }
  func.func @transform_6(%arg0: i32) -> (i32, i32, i32) {
    %c0_i32 = arith.constant 0 : i32
    %c0_i32_0 = arith.constant 0 : i32
    %c0_i32_1 = arith.constant 0 : i32
    return %arg0, %c0_i32, %c0_i32_0 : i32, i32, i32
  }
}

</mosaic_0001>

<bundles_post_ra>
// kernel: tpu_custom_call.1
= control target key start
LH: loop header
LB: loop body
LE: loop exit
PB: predicated region body
PF: predicated region fallthrough
CT: control target
= control target key end

     0   :  { %v1460_v2 = vmov 0   ;;  %s1986_s0 = inlined_call_operand.vmem [shape: f32[2,128,16], index: 0, kind: input, shape index: {}]   ;;  %s1987_s1 = inlined_call_operand.vmem [shape: s32[2,64,1], index: 1, kind: input, shape index: {}]   ;;  %s1988_s2 = inlined_call_operand.vmem [shape: s32[2,64,1], index: 2, kind: input, shape index: {}]   ;;  %s1989_s3 = inlined_call_operand.vmem [shape: f32[64,64], index: 3, kind: input, shape index: {}]   ;;  %s1990_s4 = inlined_call_operand.vmem [shape: f32[8,64], index: 4, kind: input, shape index: {}]   ;;  %s1991_s5 = inlined_call_operand.<no memory space> [shape: f32[1,1], index: 5, kind: input, shape index: {}]   ;;  %s1992_s6 = inlined_call_operand.hbm [shape: f32[1,1,2], index: 6, kind: output, shape index: {}]  }
   0x1   :  { %v55_v0 = vld [vmem:[%s1987_s1 + $0x10] sm:$0xff]  ;;  %v53_v1 = vld [vmem:[%s1987_s1] sm:$0xff]  ;;  %1437 = vset.pattern.permute.xlu1 %v1460_v2  ;;  %1436 = vset.pattern.permute.xlu0 %v1460_v2  ;;  %v56_v3 = vld [vmem:[%s1987_s1 + $0x18] sm:$0xff] }
   0x2   :  { %76 = vperm.xlu1 %1437, %v55_v0   ;;  %70 = vperm.xlu0 %1436, %v53_v1   ;;  %v54_v4 = vld [vmem:[%s1987_s1 + $0x8] sm:$0xff]  ;;  %v57_v6 = vld [vmem:[%s1987_s1 + $0x20] sm:$0xff]  ;;  %v52_v7 = vld [vmem:[%s1986_s0 + $0x78] sm:$0xff] }
   0x3   :  { %v58_v5 = vld [vmem:[%s1987_s1 + $0x28] sm:$0xff]  ;;  %1245 = vmatprep.subr.mxu0 %v52_v7  ;;  %v51_v8 = vld [vmem:[%s1986_s0 + $0x70] sm:$0xff]  ;;  %v60_v9 = vld [vmem:[%s1987_s1 + $0x38] sm:$0xff] }
   0x4   :  { %v59_v10 = vld [vmem:[%s1987_s1 + $0x30] sm:$0xff]  ;;  %1246 = vmatpush3.msra.mxu0 %v52_v7  ;;  %v50_v11 = vld [vmem:[%s1986_s0 + $0x68] sm:$0xff]  ;;  %v49_v12 = vld [vmem:[%s1986_s0 + $0x60] sm:$0xff] }
   0x5   :  { %1247 = vmatprep.subr.mxu0 %v51_v8  ;;  %v67_v13 = vld [vmem:[%s1988_s2 + $0x30] sm:$0xff]  ;;  %v68_v14 = vld [vmem:[%s1988_s2 + $0x38] sm:$0xff] }
   0x6   :  { %79 = vperm.xlu1 %1437, %v56_v3   ;;  %73 = vperm.xlu0 %1436, %v54_v4  }
   0x7   :  { %1248 = vmatpush3.msra.mxu0 %v51_v8 }
   0x8   :  { %1249 = vmatprep.subr.mxu0 %v50_v11 }
   0xa   :  { %85 = vperm.xlu1 %1437, %v58_v5   ;;  %82 = vperm.xlu0 %1436, %v57_v6  }
   0xe   :  { %91 = vperm.xlu1 %1437, %v60_v9   ;;  %88 = vperm.xlu0 %1436, %v59_v10  }
   0xf   :  { %12 = vsyncpa [#allocation4], 0  ;;  %1250 = vmatpush3.msra.mxu0 %v50_v11  ;;  %v48_v15 = vld [vmem:[%s1986_s0 + $0x58] sm:$0xff]  ;;  %v65_v16 = vld [vmem:[%s1988_s2 + $0x20] sm:$0xff]  ;;  %v35_v42 = vlaneseq  ;;  %v1461_v46 = vmov 1.0   ;;  %s1464_s18 = smov [#allocation3]  }
  0x10   :  { %1251 = vmatprep.subr.mxu0 %v49_v12  ;;  %v66_v17 = vld [vmem:[%s1988_s2 + $0x28] sm:$0xff]  ;;  %v47_v18 = vld [vmem:[%s1986_s0 + $0x50] sm:$0xff]  ;;  %v64_v21 = vld [vmem:[%s1988_s2 + $0x18] sm:$0xff]  ;;  %s1039_s19 = sshll.u32 %s1464_s18, 4  ;;  %s1040_s19 = int_to_ptr.vmem [resolvable:$true] %s1039_s19 }
  0x11   :  { %1252 = vmatpush3.msra.mxu0 %v49_v12  ;;  %v46_v19 = vld [vmem:[%s1986_s0 + $0x48] sm:$0xff]  ;;  %v63_v20 = vld [vmem:[%s1988_s2 + $0x10] sm:$0xff]  ;;  %v45_v22 = vld [vmem:[%s1986_s0 + $0x40] sm:$0xff]  ;;  %v1623_v43 = vand.u32 127, %v35_v42  ;;  %s1438_s20 = scalar_lea.vmem %s1040_s19, 16  ;;  %s1442_s21 = scalar_lea.vmem %s1040_s19, 32 }
  0x12   :  { %241 = vperm.xlu1 %1437, %v67_v13   ;;  %244 = vperm.xlu0 %1436, %v68_v14   ;;  %v61_v23 = vld [vmem:[%s1988_s2] sm:$0xff]  ;;  %v62_v24 = vld [vmem:[%s1988_s2 + $0x8] sm:$0xff]  ;;  %v44_v25 = vld [vmem:[%s1986_s0 + $0x38] sm:$0xff]  ;;  %p1439_p0 = scmp.ne.s32.totalorder %s1040_s19, %s1438_s20  ;;  %p1443_p1 = scmp.lt.s32.totalorder %s1040_s19, %s1040_s19 }
  0x13   :  { %1253 = vmatprep.subr.mxu0 %v48_v15  ;;  %v43_v26 = vld [vmem:[%s1986_s0 + $0x30] sm:$0xff]  ;;  %v1098_v27 = vld [vmem:[%s1987_s1 + $0x48] sm:$0xff]  ;;  %v1097_v28 = vld [vmem:[%s1987_s1 + $0x40] sm:$0xff]  ;;  %p1444_p2 = scmp.lt.s32.totalorder %s1442_s21, %s1438_s20 }
  0x14   :  { %1254 = vmatpush3.msra.mxu0 %v48_v15  ;;  %v42_v29 = vld [vmem:[%s1986_s0 + $0x28] sm:$0xff]  ;;  %v1100_v30 = vld [vmem:[%s1987_s1 + $0x58] sm:$0xff]  ;;  %v1099_v31 = vld [vmem:[%s1987_s1 + $0x50] sm:$0xff] }
  0x15   :  { %1255 = vmatprep.subr.mxu0 %v47_v18  ;;  %v41_v32 = vld [vmem:[%s1986_s0 + $0x20] sm:$0xff]  ;;  %v40_v33 = vld [vmem:[%s1986_s0 + $0x18] sm:$0xff]  ;;  %v1102_v34 = vld [vmem:[%s1987_s1 + $0x68] sm:$0xff]  ;;  %p1445_p3 = por %p1444_p2, %p1443_p1 }
  0x16   :  { %235 = vperm.xlu1 %1437, %v65_v16   ;;  %238 = vperm.xlu0 %1436, %v66_v17   ;;  %v1101_v35 = vld [vmem:[%s1987_s1 + $0x60] sm:$0xff]  ;;  %v39_v36 = vld [vmem:[%s1986_s0 + $0x10] sm:$0xff]  ;;  %v1104_v37 = vld [vmem:[%s1987_s1 + $0x78] sm:$0xff] }
  0x17   :  { %1256 = vmatpush3.msra.mxu0 %v47_v18  ;;  %v1103_v38 = vld [vmem:[%s1987_s1 + $0x70] sm:$0xff]  ;;  %v38_v39 = vld [vmem:[%s1986_s0 + $0x8] sm:$0xff]  ;;  %v37_v40 = vld [vmem:[%s1986_s0] sm:$0xff]  ;;  %p1446_p4 = pnand %p1445_p3, %p1439_p0 }
  0x18   :  { %1257 = vmatprep.subr.mxu0 %v46_v19  ;;  %v1096_v41 = vld [vmem:[%s1986_s0 + $0xf8] sm:$0xff]  ;;  %v1095_v49 = vld [vmem:[%s1986_s0 + $0xf0] sm:$0xff]  ;;  %v1094_v50 = vld [vmem:[%s1986_s0 + $0xe8] sm:$0xff] }
  0x19   :  { %1258 = vmatpush3.msra.mxu0 %v46_v19  ;;  %v1093_v53 = vld [vmem:[%s1986_s0 + $0xe0] sm:$0xff]  ;;  %v1092_v54 = vld [vmem:[%s1986_s0 + $0xd8] sm:$0xff]  ;;  %v1091_v57 = vld [vmem:[%s1986_s0 + $0xd0] sm:$0xff] }
  0x1a   :  { %229 = vperm.xlu1 %1437, %v63_v20   ;;  %232 = vperm.xlu0 %1436, %v64_v21   ;;  %v1090_v58 = vld [vmem:[%s1986_s0 + $0xc8] sm:$0xff]  ;;  %v1089_v61 = vld [vmem:[%s1986_s0 + $0xc0] sm:$0xff]  ;;  %v1088_v62 = vld [vmem:[%s1986_s0 + $0xb8] sm:$0xff] }
  0x1b   :  { %1259 = vmatprep.subr.mxu0 %v45_v22  ;;  %v1087_v1 = vld [vmem:[%s1986_s0 + $0xb0] sm:$0xff]  ;;  %v1086_v2 = vld [vmem:[%s1986_s0 + $0xa8] sm:$0xff]  ;;  %v1085_v5 = vld [vmem:[%s1986_s0 + $0xa0] sm:$0xff] }
  0x1c   :  { %1260 = vmatpush3.msra.mxu0 %v45_v22  ;;  %v1084_v6 = vld [vmem:[%s1986_s0 + $0x98] sm:$0xff]  ;;  %v1083_v9 = vld [vmem:[%s1986_s0 + $0x90] sm:$0xff]  ;;  %v1082_v10 = vld [vmem:[%s1986_s0 + $0x88] sm:$0xff] }
  0x1d   :  { %1261 = vmatprep.subr.mxu0 %v44_v25  ;;  %v1081_v13 = vld [vmem:[%s1986_s0 + $0x80] sm:$0xff] }
  0x1e   :  { %223 = vperm.xlu1 %1437, %v61_v23   ;;  %226 = vperm.xlu0 %1436, %v62_v24  }
  0x1f   :  { %1262 = vmatpush3.msra.mxu0 %v44_v25 }
  0x20   :  { %1263 = vmatprep.subr.mxu0 %v43_v26 }
  0x21   :  { %1264 = vmatpush3.msra.mxu0 %v43_v26 }
  0x22   :  { %587 = vperm.xlu1 %1437, %v1098_v27   ;;  %584 = vperm.xlu0 %1436, %v1097_v28   ;;  %v1462_v27 = vmov 0.0  }
  0x23   :  { %1265 = vmatprep.subr.mxu0 %v42_v29 }
  0x24   :  { %1266 = vmatpush3.msra.mxu0 %v42_v29 }
  0x25   :  { %1267 = vmatprep.subr.mxu0 %v41_v32 }
  0x26   :  { %593 = vperm.xlu1 %1437, %v1100_v30   ;;  %590 = vperm.xlu0 %1436, %v1099_v31  }
  0x27   :  { %1268 = vmatpush3.msra.mxu0 %v41_v32 }
  0x28   :  { %1269 = vmatprep.subr.mxu0 %v40_v33 }
  0x29   :  { %1270 = vmatpush3.msra.mxu0 %v40_v33 }
  0x2a   :  { %599 = vperm.xlu1 %1437, %v1102_v34   ;;  %596 = vperm.xlu0 %1436, %v1101_v35  }
  0x2b   :  { %1271 = vmatprep.subr.mxu0 %v39_v36 }
  0x2c   :  { %1272 = vmatpush3.msra.mxu0 %v39_v36 }
  0x2d   :  { %1273 = vmatprep.subr.mxu0 %v38_v39 }
  0x2e   :  { %605 = vperm.xlu1 %1437, %v1104_v37   ;;  %602 = vperm.xlu0 %1436, %v1103_v38  }
  0x2f   :  { %1274 = vmatpush3.msra.mxu0 %v38_v39 }
  0x30   :  { %1275 = vmatprep.subr.mxu0 %v37_v40 }
  0x31   :  { %1276 = vmatpush3.msra.mxu0 %v37_v40 }
  0x32   :  { %1336 = vmatprep.subr.mxu0 %v1096_v41 }
  0x7d   :  { %v77_v44 = vpop.permute.xlu1 %76  ;;  %v71_v45 = vpop.permute.xlu0 %70 }
  0x7e   :  { %vm93_vm0 = vcmp.eq.s32.totalorder %v1623_v43, %v71_v45  ;;  %vm95_vm1 = vcmp.eq.s32.totalorder %v1623_v43, %v77_v44 }
  0x7f   :  { %1277 = vmatprep.mubr.msk.f32.mxu0 %vm93_vm0, %v1461_v46 }
  0x81   :  { %v80_v47 = vpop.permute.xlu1 %79  ;;  %v74_v48 = vpop.permute.xlu0 %73 }
  0x82   :  { %vm94_vm2 = vcmp.eq.s32.totalorder %v1623_v43, %v74_v48  ;;  %vm96_vm3 = vcmp.eq.s32.totalorder %v1623_v43, %v80_v47 }
  0x83   :  { %1278 = vmatmul.mubr.msk.f32.vlgmr.msra.gmra.mxu0 %vm94_vm2, %v1461_v46 }
  0x84   :  { %1337 = vmatpush3.msra.mxu0 %v1096_v41  ;;  %1280 = vmatprep.mubr.msk.f32.mxu0 %vm95_vm1, %v1461_v46 }
  0x85   :  { %1338 = vmatprep.subr.mxu0 %v1095_v49  ;;  %v86_v51 = vpop.permute.xlu1 %85  ;;  %v83_v52 = vpop.permute.xlu0 %82 }
  0x86   :  { %vm97_vm4 = vcmp.eq.s32.totalorder %v1623_v43, %v83_v52  ;;  %1339 = vmatpush3.msra.mxu0 %v1095_v49  ;;  %vm98_vm5 = vcmp.eq.s32.totalorder %v1623_v43, %v86_v51 }
  0x87   :  { %1340 = vmatprep.subr.mxu0 %v1094_v50  ;;  %1281 = vmatmul.mubr.msk.f32.gmra.mxu0 %vm96_vm3, %v1461_v46 }
  0x88   :  { %1341 = vmatpush3.msra.mxu0 %v1094_v50  ;;  %1283 = vmatprep.mubr.msk.f32.mxu0 %vm97_vm4, %v1461_v46  ;;  %vm278_vm4 = vcmask 130048  }
  0x89   :  { %1342 = vmatprep.subr.mxu0 %v1093_v53  ;;  %v92_v55 = vpop.permute.xlu1 %91  ;;  %v89_v56 = vpop.permute.xlu0 %88 }
  0x8a   :  { %vm99_vm6 = vcmp.eq.s32.totalorder %v1623_v43, %v89_v56  ;;  %1343 = vmatpush3.msra.mxu0 %v1093_v53  ;;  %vm100_vm7 = vcmp.eq.s32.totalorder %v1623_v43, %v92_v55  ;;  %v1756_v55 = vld [vmem:[%s1989_s3] sm:$0xff]  ;;  %v1110_v56 = vld [vmem:[%s1988_s2 + $0x68] sm:$0xff] }
  0x8b   :  { %1344 = vmatprep.subr.mxu0 %v1092_v54  ;;  %1284 = vmatmul.mubr.msk.f32.gmra.mxu0 %vm98_vm5, %v1461_v46 }
  0x8c   :  { %1345 = vmatpush3.msra.mxu0 %v1092_v54  ;;  %1286 = vmatprep.mubr.msk.f32.mxu0 %vm99_vm6, %v1461_v46  ;;  %v1112_v54 = vld [vmem:[%s1988_s2 + $0x78] sm:$0xff] }
  0x8d   :  { %1346 = vmatprep.subr.mxu0 %v1091_v57  ;;  %v1657_v59 = vpop.permute.xlu1 %241  ;;  %v1659_v60 = vpop.permute.xlu0 %244 }
  0x8e   :  { %1347 = vmatpush3.msra.mxu0 %v1091_v57  ;;  %vm253_vm0 = vcmp.eq.s32.totalorder %v1623_v43, %v1659_v60  ;;  %vm252_vm1 = vcmp.eq.s32.totalorder %v1623_v43, %v1657_v59  ;;  %v1109_v57 = vld [vmem:[%s1988_s2 + $0x60] sm:$0xff]  ;;  %v1107_v59 = vld [vmem:[%s1988_s2 + $0x50] sm:$0xff]  ;;  %v1108_v60 = vld [vmem:[%s1988_s2 + $0x58] sm:$0xff] }
  0x8f   :  { %1348 = vmatprep.subr.mxu0 %v1090_v58  ;;  %1287 = vmatmul.mubr.msk.f32.gmra.mxu0 %vm100_vm7, %v1461_v46  ;;  %v1070_v28 = vsel %vm253_vm0, 1.0, %v1462_v27  ;;  %v1069_v32 = vsel %vm252_vm1, 1.0, %v1462_v27 }
  0x90   :  { %1349 = vmatpush3.msra.mxu0 %v1090_v58  ;;  %v1111_v58 = vld [vmem:[%s1988_s2 + $0x70] sm:$0xff] }
  0x91   :  { %1350 = vmatprep.subr.mxu0 %v1089_v61  ;;  %v1669_v63 = vpop.permute.xlu1 %235  ;;  %v1671_v0 = vpop.permute.xlu0 %238 }
  0x92   :  { %1351 = vmatpush3.msra.mxu0 %v1089_v61  ;;  %vm251_vm2 = vcmp.eq.s32.totalorder %v1623_v43, %v1671_v0  ;;  %vm250_vm5 = vcmp.eq.s32.totalorder %v1623_v43, %v1669_v63  ;;  %v1105_v61 = vld [vmem:[%s1988_s2 + $0x40] sm:$0xff] }
  0x93   :  { %1352 = vmatprep.subr.mxu0 %v1088_v62  ;;  %v1068_v30 = vsel %vm251_vm2, 1.0, %v1462_v27  ;;  %v1067_v39 = vsel %vm250_vm5, 1.0, %v1462_v27  ;;  %vm1463_vm2 = vmmov 0   ;;  %vm1025_vm5 = vcmp.eq.s32.totalorder %v1623_v43, 1 }
  0x94   :  { %1353 = vmatpush3.msra.mxu0 %v1088_v62  ;;  %v1106_v62 = vld [vmem:[%s1988_s2 + $0x48] sm:$0xff] }
  0x95   :  { %1354 = vmatprep.subr.mxu0 %v1087_v1  ;;  %v1679_v3 = vpop.permute.xlu1 %229  ;;  %v1681_v4 = vpop.permute.xlu0 %232 }
  0x96   :  { %1355 = vmatpush3.msra.mxu0 %v1087_v1  ;;  %vm249_vm3 = vcmp.eq.s32.totalorder %v1623_v43, %v1681_v4  ;;  %vm248_vm7 = vcmp.eq.s32.totalorder %v1623_v43, %v1679_v3 }
  0x97   :  { %1356 = vmatprep.subr.mxu0 %v1086_v2  ;;  %v1066_v36 = vsel %vm249_vm3, 1.0, %v1462_v27  ;;  %vm531_vm3 = vcmask 7168  }
  0x98   :  { %1357 = vmatpush3.msra.mxu0 %v1086_v2 }
  0x99   :  { %1358 = vmatprep.subr.mxu0 %v1085_v5  ;;  %v1689_v7 = vpop.permute.xlu1 %223  ;;  %v1691_v8 = vpop.permute.xlu0 %226 }
  0x9a   :  { %1359 = vmatpush3.msra.mxu0 %v1085_v5  ;;  %vm247_vm6 = vcmp.eq.s32.totalorder %v1623_v43, %v1691_v8 }
  0x9b   :  { %1360 = vmatprep.subr.mxu0 %v1084_v6  ;;  %v1064_v42 = vsel %vm247_vm6, 1.0, %v1462_v27  ;;  %vm1031_vm6 = vcmask 8192  }
  0x9c   :  { %1361 = vmatpush3.msra.mxu0 %v1084_v6 }
  0x9d   :  { %1362 = vmatprep.subr.mxu0 %v1083_v9  ;;  %v588_v11 = vpop.permute.xlu1 %587  ;;  %v585_v12 = vpop.permute.xlu0 %584 }
  0x9e   :  { %vm607_vm8 = vcmp.eq.s32.totalorder %v1623_v43, %v585_v12  ;;  %1363 = vmatpush3.msra.mxu0 %v1083_v9  ;;  %vm608_vm9 = vcmp.eq.s32.totalorder %v1623_v43, %v588_v11 }
  0x9f   :  { %1364 = vmatprep.subr.mxu0 %v1082_v10  ;;  %1368 = vmatprep.mubr.msk.f32.mxu0 %vm607_vm8, %v1461_v46  ;;  %vm246_vm8 = vcmp.eq.s32.totalorder %v1623_v43, %v1689_v7 }
  0xa0   :  { %1365 = vmatpush3.msra.mxu0 %v1082_v10  ;;  %v1063_v50 = vsel %vm246_vm8, 1.0, %v1462_v27 }
  0xa1   :  { %1366 = vmatprep.subr.mxu0 %v1081_v13  ;;  %v594_v14 = vpop.permute.xlu1 %593  ;;  %v591_v15 = vpop.permute.xlu0 %590 }
  0xa2   :  { %vm609_vm10 = vcmp.eq.s32.totalorder %v1623_v43, %v591_v15  ;;  %1367 = vmatpush3.msra.mxu0 %v1081_v13  ;;  %vm610_vm11 = vcmp.eq.s32.totalorder %v1623_v43, %v594_v14 }
  0xa3   :  { %1369 = vmatmul.mubr.msk.f32.vlgmr.msra.gmra.mxu0 %vm608_vm9, %v1461_v46  ;;  %vm303_vm9 = vcmask 523264  }
  0xa4   :  { %1371 = vmatprep.mubr.msk.f32.mxu0 %vm609_vm10, %v1461_v46  ;;  %1305 = vmatprep.mubr.msk.f32.mxu1 %vm303_vm9, %v1756_v55 }
  0xa5   :  { %v600_v16 = vpop.permute.xlu1 %599  ;;  %v597_v17 = vpop.permute.xlu0 %596 }
  0xa6   :  { %vm611_vm12 = vcmp.eq.s32.totalorder %v1623_v43, %v597_v17  ;;  %vm612_vm13 = vcmp.eq.s32.totalorder %v1623_v43, %v600_v16  ;;  %v1824_v16 = vld [vmem:[%s1989_s3 + $0x8] sm:$0xff] }
  0xa7   :  { %1372 = vmatmul.mubr.msk.f32.gmra.mxu0 %vm610_vm11, %v1461_v46 }
  0xa8   :  { %1374 = vmatprep.mubr.msk.f32.mxu0 %vm611_vm12, %v1461_v46 }
  0xa9   :  { %v603_v18 = vpop.permute.xlu0 %602  ;;  %v606_v19 = vpop.permute.xlu1 %605 }
  0xaa   :  { %vm613_vm14 = vcmp.eq.s32.totalorder %v1623_v43, %v603_v18  ;;  %vm614_vm15 = vcmp.eq.s32.totalorder %v1623_v43, %v606_v19  ;;  %v1830_v18 = vld [vmem:[%s1989_s3 + $0x10] sm:$0xff] }
  0xab   :  { %1375 = vmatmul.mubr.msk.f32.gmra.mxu0 %vm612_vm13, %v1461_v46 }
  0xac   :  { %1377 = vmatprep.mubr.msk.f32.mxu0 %vm613_vm14, %v1461_v46 }
  0xaf   :  { %1378 = vmatmul.mubr.msk.f32.gmra.mxu0 %vm614_vm15, %v1461_v46  ;;  %v1065_v46 = vsel %vm248_vm7, 1.0, %v1462_v27 }
 0x143   :  { %v1279_v20 = vpop.f32.mrf.mxu0 }
 0x144   :  { %v271_v44 = vmul.f32 %v1279_v20, %v1064_v42 }
 0x145   :  { %v183_v21 = vpop.f32.mrf.mxu0 }
 0x146   :  { %v282_v49 = vsel %vm278_vm4, %v271_v44, 0.0  ;;  %v270_v51 = vmul.f32 %v1063_v50, %v183_v21 }
 0x147   :  { %v1282_v22 = vpop.f32.mrf.mxu0 }
 0x148   :  { %v273_v37 = vmul.f32 %v1282_v22, %v1066_v36  ;;  %v279_v53 = vsel %vm278_vm4, %v270_v51, 0.0  ;;  %v1844_v22 = vld [vmem:[%s1989_s3 + $0x18] sm:$0xff] }
 0x149   :  { %v193_v23 = vpop.f32.mrf.mxu0 }
 0x14a   :  { %v288_v45 = vsel %vm278_vm4, %v273_v37, 0.0  ;;  %v272_v47 = vmul.f32 %v1065_v46, %v193_v23 }
 0x14b   :  { %v1285_v24 = vpop.f32.mrf.mxu0 }
 0x14c   :  { %v275_v33 = vmul.f32 %v1285_v24, %v1068_v30  ;;  %v285_v52 = vsel %vm278_vm4, %v272_v47, 0.0  ;;  %v1849_v24 = vld [vmem:[%s1989_s3 + $0x20] sm:$0xff]  ;;  %v1861_v30 = vld [vmem:[%s1989_s3 + $0x28] sm:$0xff] }
 0x14d   :  { %v203_v25 = vpop.f32.mrf.mxu0 }
 0x14e   :  { %v274_v40 = vmul.f32 %v1067_v39, %v203_v25  ;;  %v294_v41 = vsel %vm278_vm4, %v275_v33, 0.0 }
 0x14f   :  { %v1288_v26 = vpop.f32.mrf.mxu0 }
 0x150   :  { %v277_v29 = vmul.f32 %v1288_v26, %v1070_v28  ;;  %v291_v48 = vsel %vm278_vm4, %v274_v40, 0.0  ;;  %v1880_v40 = vld [vmem:[%s1989_s3 + $0x38] sm:$0xff] }
 0x151   :  { %v213_v31 = vpop.f32.mrf.mxu0 }
 0x152   :  { %v276_v34 = vmul.f32 %v1069_v32, %v213_v31  ;;  %v300_v35 = vsel %vm278_vm4, %v277_v29, 0.0  ;;  %v1867_v32 = vld [vmem:[%s1989_s3 + $0x30] sm:$0xff] }
 0x153   :  { %301 = vadd.xlane.f32.xlu0 %v300_v35 }
 0x154   :  { %v297_v38 = vsel %vm278_vm4, %v276_v34, 0.0 }
 0x155   :  { %298 = vadd.xlane.f32.xlu1 %v297_v38 }
 0x157   :  { %295 = vadd.xlane.f32.xlu0 %v294_v41 }
 0x159   :  { %289 = vadd.xlane.f32.xlu1 %v288_v45 }
 0x15b   :  { %292 = vadd.xlane.f32.xlu0 %v291_v48 }
 0x15d   :  { %283 = vadd.xlane.f32.xlu1 %v282_v49 }
 0x15f   :  { %286 = vadd.xlane.f32.xlu0 %v285_v52 }
 0x163   :  { %280 = vadd.xlane.f32.xlu0 %v279_v53  ;;  %v1781_v63 = vpop.f32.mrf.mxu0 }
 0x165   :  { %v1783_v0 = vpop.f32.mrf.mxu0 }
 0x167   :  { %v1785_v1 = vpop.f32.mrf.mxu0 }
 0x169   :  { %v1794_v4 = vpop.f32.mrf.mxu0 }
 0x16b   :  { %v1376_v7 = vpop.f32.mrf.mxu0 }
 0x16d   :  { %v717_v10 = vpop.f32.mrf.mxu0 }
 0x16e   :  { %758 = vperm.xlu1 %1437, %v1112_v54  }
 0x16f   :  { %v1379_v13 = vpop.f32.mrf.mxu0 }
 0x171   :  { %v727_v33 = vpop.f32.mrf.mxu0 }
 0x172   :  { %752 = vperm.xlu1 %1437, %v1110_v56  }
 0x176   :  { %749 = vperm.xlu1 %1437, %v1109_v57  }
 0x179   :  { %755 = vperm.xlu0 %1436, %v1111_v58  }
 0x17a   :  { %743 = vperm.xlu1 %1437, %v1107_v59  }
 0x17d   :  { %746 = vperm.xlu0 %1436, %v1108_v60  }
 0x17e   :  { %737 = vperm.xlu1 %1437, %v1105_v61  }
 0x181   :  { %740 = vperm.xlu0 %1436, %v1106_v62  }
 0x1dc   :  { %v1787_v2 = vpop.xlane.xlu0 %301 }
 0x1dd   :  { %1289 = vmatprep.subr.mxu1 %v1787_v2 }
 0x1de   :  { %1290 = vmatpush3.msra.mxu1 %v1787_v2  ;;  %v1791_v3 = vpop.xlane.xlu1 %298 }
 0x1df   :  { %1291 = vmatprep.subr.mxu1 %v1791_v3 }
 0x1e0   :  { %v1796_v5 = vpop.xlane.xlu0 %295  ;;  %1292 = vmatpush3.msra.mxu1 %v1791_v3 }
 0x1e1   :  { %1293 = vmatprep.subr.mxu1 %v1796_v5 }
 0x1e2   :  { %1294 = vmatpush3.msra.mxu1 %v1796_v5  ;;  %v1801_v6 = vpop.xlane.xlu1 %289 }
 0x1e4   :  { %v1803_v8 = vpop.xlane.xlu0 %292 }
 0x1e5   :  { %1295 = vmatprep.subr.mxu1 %v1803_v8 }
 0x1e6   :  { %1296 = vmatpush3.msra.mxu1 %v1803_v8  ;;  %v1807_v9 = vpop.xlane.xlu1 %283 }
 0x1e7   :  { %1297 = vmatprep.subr.mxu1 %v1801_v6 }
 0x1e8   :  { %v1810_v11 = vpop.xlane.xlu0 %286  ;;  %1298 = vmatpush3.msra.mxu1 %v1801_v6 }
 0x1e9   :  { %1299 = vmatprep.subr.mxu1 %v1810_v11 }
 0x1ea   :  { %1300 = vmatpush3.msra.mxu1 %v1810_v11  ;;  %v759_v12 = vpop.permute.xlu1 %758 }
 0x1eb   :  { %vm767_vm10 = vcmp.eq.s32.totalorder %v1623_v43, %v759_v12  ;;  %1301 = vmatprep.subr.mxu1 %v1807_v9 }
 0x1ec   :  { %v1136_v14 = vsel %vm767_vm10, 1.0, %v1462_v27  ;;  %v1818_v15 = vpop.xlane.xlu0 %280  ;;  %1302 = vmatpush3.msra.mxu1 %v1807_v9 }
 0x1ed   :  { %1303 = vmatprep.subr.mxu1 %v1818_v15  ;;  %v791_v17 = vmul.f32 %v1379_v13, %v1136_v14 }
 0x1ee   :  { %1304 = vmatpush3.msra.mxu1 %v1818_v15  ;;  %v753_v19 = vpop.permute.xlu1 %752 }
 0x1ef   :  { %vm765_vm11 = vcmp.eq.s32.totalorder %v1623_v43, %v753_v19  ;;  %1306 = vmatmul.mubr.msk.f32.vlgmr.msra.gmra.mxu1 %vm303_vm9, %v1824_v16  ;;  %v813_v20 = vsel %vm278_vm4, %v791_v17, 0.0  ;;  %1317 = vmatprep.subr.mxu1 %v1462_v27 }
 0x1f0   :  { %v1134_v21 = vsel %vm765_vm11, 1.0, %v1462_v27  ;;  %814 = vadd.xlane.f32.xlu0 %v813_v20  ;;  %1308 = vmatprep.mubr.msk.f32.mxu1 %vm303_vm9, %v1830_v18 }
 0x1f1   :  { %v789_v23 = vmul.f32 %v1376_v7, %v1134_v21 }
 0x1f2   :  { %v750_v25 = vpop.permute.xlu1 %749 }
 0x1f3   :  { %vm764_vm12 = vcmp.eq.s32.totalorder %v1623_v43, %v750_v25  ;;  %1309 = vmatmul.mubr.msk.f32.gmra.mxu1 %vm303_vm9, %v1844_v22  ;;  %v807_v26 = vsel %vm278_vm4, %v789_v23, 0.0 }
 0x1f4   :  { %v1133_v28 = vsel %vm764_vm12, 1.0, %v1462_v27  ;;  %v756_v29 = vpop.permute.xlu0 %755  ;;  %808 = vadd.xlane.f32.xlu0 %v807_v26  ;;  %1311 = vmatprep.mubr.msk.f32.mxu1 %vm303_vm9, %v1849_v24 }
 0x1f5   :  { %vm766_vm13 = vcmp.eq.s32.totalorder %v1623_v43, %v756_v29  ;;  %v788_v31 = vmul.f32 %v1133_v28, %v717_v10 }
 0x1f6   :  { %v1135_v34 = vsel %vm766_vm13, 1.0, %v1462_v27  ;;  %v744_v35 = vpop.permute.xlu1 %743 }
 0x1f7   :  { %vm762_vm14 = vcmp.eq.s32.totalorder %v1623_v43, %v744_v35  ;;  %1312 = vmatmul.mubr.msk.f32.gmra.mxu1 %vm303_vm9, %v1861_v30  ;;  %v804_v36 = vsel %vm278_vm4, %v788_v31, 0.0  ;;  %v790_v37 = vmul.f32 %v1135_v34, %v727_v33  ;;  %v1933_v35 = vld [vmem:[%s1990_s4] sm:$0xff] }
 0x1f8   :  { %v1131_v38 = vsel %vm762_vm14, 1.0, %v1462_v27  ;;  %v747_v39 = vpop.permute.xlu0 %746  ;;  %805 = vadd.xlane.f32.xlu0 %v804_v36  ;;  %1314 = vmatprep.mubr.msk.f32.mxu1 %vm303_vm9, %v1867_v32 }
 0x1f9   :  { %vm763_vm15 = vcmp.eq.s32.totalorder %v1623_v43, %v747_v39  ;;  %v810_v41 = vsel %vm278_vm4, %v790_v37, 0.0  ;;  %v786_v42 = vmul.f32 %v1131_v38, %v1794_v4 }
 0x1fa   :  { %v1132_v44 = vsel %vm763_vm15, 1.0, %v1462_v27  ;;  %811 = vadd.xlane.f32.xlu1 %v810_v41  ;;  %v738_v45 = vpop.permute.xlu1 %737 }
 0x1fb   :  { %vm760_vm0 = vcmp.eq.s32.totalorder %v1623_v43, %v738_v45  ;;  %1315 = vmatmul.mubr.msk.f32.gmra.mxu1 %vm303_vm9, %v1880_v40  ;;  %v798_v46 = vsel %vm278_vm4, %v786_v42, 0.0  ;;  %v787_v47 = vmul.f32 %v1785_v1, %v1132_v44 }
 0x1fc   :  { %v1129_v48 = vsel %vm760_vm0, 1.0, %v1462_v27  ;;  %v741_v49 = vpop.permute.xlu0 %740  ;;  %799 = vadd.xlane.f32.xlu0 %v798_v46  ;;  %1333 = vmatprep.mubr.msk.f32.mxu1 %vm1463_vm2, %v1462_v27 }
 0x1fd   :  { %vm761_vm1 = vcmp.eq.s32.totalorder %v1623_v43, %v741_v49  ;;  %v801_v50 = vsel %vm278_vm4, %v787_v47, 0.0  ;;  %v784_v51 = vmul.f32 %v1129_v48, %v1783_v0 }
 0x1fe   :  { %v1130_v52 = vsel %vm761_vm1, 1.0, %v1462_v27  ;;  %802 = vadd.xlane.f32.xlu1 %v801_v50 }
 0x1ff   :  { %v792_v53 = vsel %vm278_vm4, %v784_v51, 0.0  ;;  %v785_v54 = vmul.f32 %v1781_v63, %v1130_v52  ;;  %v1906_v63 = vstv %s1991_s5 }
 0x200   :  { %793 = vadd.xlane.f32.xlu0 %v792_v53 }
 0x201   :  { %v795_v56 = vsel %vm278_vm4, %v785_v54, 0.0  ;;  %vm542_vm4 = vcmp.eq.s32.totalorder %v1623_v43, 0 }
 0x202   :  { %796 = vadd.xlane.f32.xlu1 %v795_v56 }
 0x283   :  { %v812_v36 = vpop.xlane.xlu1 %811 }
 0x287   :  { %v803_v38 = vpop.xlane.xlu1 %802 }
 0x28b   :  { %v797_v41 = vpop.xlane.xlu1 %796 }
 0x2af   :  { %v1307_v57 = vpop.f32.mrf.mxu1 }
 0x2b1   :  { %v394_v58 = vpop.f32.mrf.mxu1 }
 0x2b2   :  { %v433_v25 = vsub.f32 %v394_v58, %v1818_v15 }
 0x2b3   :  { %v1310_v59 = vpop.f32.mrf.mxu1 }
 0x2b4   :  { %v436_v14 = vsub.f32 %v1310_v59, %v1801_v6  ;;  %v1920_v6 = vpop.xlane.xlu0 %814 }
 0x2b5   :  { %v404_v60 = vpop.f32.mrf.mxu1 }
 0x2b6   :  { %v445_v23 = vadd.f32 %v1906_v63, %v436_v14 }
 0x2b7   :  { %v1313_v61 = vpop.f32.mrf.mxu1 }
 0x2b8   :  { %v438_v1 = vsub.f32 %v1313_v61, %v1796_v5  ;;  %v453_v29 = vmax.f32 %v445_v23, 0.0  ;;  %v809_v33 = vpop.xlane.xlu0 %808 }
 0x2b9   :  { %v414_v62 = vpop.f32.mrf.mxu1 }
 0x2ba   :  { %v437_v10 = vsub.f32 %v414_v62, %v1803_v8  ;;  %v447_v17 = vadd.f32 %v1906_v63, %v438_v1  ;;  %v434_v8 = vsub.f32 %v1307_v57, %v1807_v9  ;;  %v442_v9 = vadd.f32 %v1906_v63, %v433_v25 }
 0x2bb   :  { %v1316_v0 = vpop.f32.mrf.mxu1 }
 0x2bc   :  { %v440_v4 = vsub.f32 %v1316_v0, %v1787_v2  ;;  %v435_v2 = vsub.f32 %v404_v60, %v1810_v11  ;;  %v446_v20 = vadd.f32 %v1906_v63, %v437_v10  ;;  %v443_v28 = vadd.f32 %v1906_v63, %v434_v8  ;;  %v806_v37 = vpop.xlane.xlu0 %805 }
 0x2bd   :  { %v424_v7 = vpop.f32.mrf.mxu1  ;;  %v450_v34 = vmax.f32 %v442_v9, 0.0 }
 0x2be   :  { %v449_v12 = vadd.f32 %v1906_v63, %v440_v4  ;;  %v439_v13 = vsub.f32 %v424_v7, %v1791_v3  ;;  %v455_v3 = vmax.f32 %v447_v17, 0.0  ;;  %v444_v11 = vadd.f32 %v1906_v63, %v435_v2 }
 0x2bf   :  { %v454_v26 = vmax.f32 %v446_v20, 0.0  ;;  %v451_v15 = vmax.f32 %v443_v28, 0.0 }
 0x2c0   :  { %v457_v19 = vmax.f32 %v449_v12, 0.0  ;;  %v448_v5 = vadd.f32 %v1906_v63, %v439_v13  ;;  %v452_v31 = vmax.f32 %v444_v11, 0.0  ;;  %v800_v39 = vpop.xlane.xlu0 %799 }
 0x2c2   :  { %v456_v21 = vmax.f32 %v448_v5, 0.0  ;;  %1318 = vmatpush3.msra.mxu1 %v457_v19 }
 0x2c3   :  { %1319 = vmatprep.subr.mxu1 %v1462_v27 }
 0x2c4   :  { %1320 = vmatpush3.msra.mxu1 %v456_v21  ;;  %v794_v42 = vpop.xlane.xlu0 %793 }
 0x2c5   :  { %1321 = vmatprep.subr.mxu1 %v1462_v27 }
 0x2c6   :  { %1322 = vmatpush3.msra.mxu1 %v455_v3 }
 0x2c7   :  { %1323 = vmatprep.subr.mxu1 %v1462_v27 }
 0x2c8   :  { %1324 = vmatpush3.msra.mxu1 %v454_v26 }
 0x2c9   :  { %1325 = vmatprep.subr.mxu1 %v1462_v27 }
 0x2ca   :  { %1326 = vmatpush3.msra.mxu1 %v453_v29 }
 0x2cb   :  { %1327 = vmatprep.subr.mxu1 %v1462_v27 }
 0x2cc   :  { %1328 = vmatpush3.msra.mxu1 %v452_v31 }
 0x2cd   :  { %1329 = vmatprep.subr.mxu1 %v1462_v27 }
 0x2ce   :  { %1330 = vmatpush3.msra.mxu1 %v451_v15 }
 0x2cf   :  { %1331 = vmatprep.subr.mxu1 %v1462_v27 }
 0x2d0   :  { %1332 = vmatpush3.msra.mxu1 %v450_v34  ;;  %v1146_v34 = vsel %vm1025_vm5, 1.0, %v1462_v27 }
 0x2d1   :  { %1334 = vmatmul.mubr.msk.f32.vlgmr.msra.gmra.mxu1 %vm303_vm9, %v1933_v35  ;;  %1380 = vmatprep.subr.mxu1 %v1920_v6 }
 0x2d2   :  { %1381 = vmatpush3.msra.mxu1 %v1920_v6  ;;  %1396 = vmatprep.mubr.msk.f32.mxu1 %vm303_vm9, %v1756_v55 }
 0x2d3   :  { %1382 = vmatprep.subr.mxu1 %v812_v36 }
 0x2d4   :  { %1383 = vmatpush3.msra.mxu1 %v812_v36 }
 0x2d5   :  { %1384 = vmatprep.subr.mxu1 %v809_v33 }
 0x2d6   :  { %1385 = vmatpush3.msra.mxu1 %v809_v33 }
 0x2d7   :  { %1386 = vmatprep.subr.mxu1 %v806_v37 }
 0x2d8   :  { %1387 = vmatpush3.msra.mxu1 %v806_v37 }
 0x2d9   :  { %1388 = vmatprep.subr.mxu1 %v803_v38 }
 0x2da   :  { %1389 = vmatpush3.msra.mxu1 %v803_v38 }
 0x2db   :  { %1390 = vmatprep.subr.mxu1 %v800_v39 }
 0x2dc   :  { %1391 = vmatpush3.msra.mxu1 %v800_v39 }
 0x2dd   :  { %1392 = vmatprep.subr.mxu1 %v797_v41 }
 0x2de   :  { %1393 = vmatpush3.msra.mxu1 %v797_v41 }
 0x2df   :  { %1394 = vmatprep.subr.mxu1 %v794_v42 }
 0x2e0   :  { %1395 = vmatpush3.msra.mxu1 %v794_v42 }
 0x2e1   :  { %1397 = vmatmul.mubr.msk.f32.vlgmr.msra.gmra.mxu1 %vm303_vm9, %v1824_v16  ;;  %1408 = vmatprep.subr.mxu1 %v1462_v27 }
 0x2e2   :  { %1399 = vmatprep.mubr.msk.f32.mxu1 %vm303_vm9, %v1830_v18 }
 0x2e5   :  { %1400 = vmatmul.mubr.msk.f32.gmra.mxu1 %vm303_vm9, %v1844_v22 }
 0x2e6   :  { %1402 = vmatprep.mubr.msk.f32.mxu1 %vm303_vm9, %v1849_v24 }
 0x2e9   :  { %1403 = vmatmul.mubr.msk.f32.gmra.mxu1 %vm303_vm9, %v1861_v30 }
 0x2ea   :  { %1405 = vmatprep.mubr.msk.f32.mxu1 %vm303_vm9, %v1867_v32 }
 0x2ed   :  { %1406 = vmatmul.mubr.msk.f32.gmra.mxu1 %vm303_vm9, %v1880_v40 }
 0x2ee   :  { %1424 = vmatprep.mubr.msk.f32.mxu1 %vm1463_vm2, %v1462_v27 }
 0x391   :  { %v527_v55 = vpop.f32.mrf.mxu1 }
 0x392   :  { %v532_v16 = vsel %vm531_vm3, %v527_v55, -inf }
 0x393   :  { %533 = vmax.xlane.f32.xlu1 %v532_v16  ;;  %v1335_v18 = vpop.f32.mrf.mxu1 }
 0x3a1   :  { %v1398_v22 = vpop.f32.mrf.mxu1 }
 0x3a2   :  { %v922_v60 = vsub.f32 %v1398_v22, %v797_v41 }
 0x3a3   :  { %v882_v24 = vpop.f32.mrf.mxu1 }
 0x3a4   :  { %v921_v0 = vsub.f32 %v882_v24, %v794_v42  ;;  %v930_v7 = vadd.f32 %v922_v60, %v1906_v63 }
 0x3a5   :  { %v1401_v44 = vpop.f32.mrf.mxu1 }
 0x3a6   :  { %v924_v52 = vsub.f32 %v1401_v44, %v803_v38  ;;  %v929_v12 = vadd.f32 %v921_v0, %v1906_v63  ;;  %v938_v14 = vmax.f32 %v930_v7, 0.0 }
 0x3a7   :  { %v892_v45 = vpop.f32.mrf.mxu1 }
 0x3a8   :  { %v923_v57 = vsub.f32 %v892_v45, %v800_v39  ;;  %v932_v61 = vadd.f32 %v924_v52, %v1906_v63  ;;  %v937_v17 = vmax.f32 %v929_v12, 0.0 }
 0x3a9   :  { %v1404_v30 = vpop.f32.mrf.mxu1 }
 0x3aa   :  { %v926_v32 = vsub.f32 %v1404_v30, %v809_v33  ;;  %v931_v1 = vadd.f32 %v923_v57, %v1906_v63  ;;  %v940_v10 = vmax.f32 %v932_v61, 0.0  ;;  %v1080_v33 = vsel %vm542_vm4, 1.0, %v1462_v27 }
 0x3ab   :  { %v902_v46 = vpop.f32.mrf.mxu1 }
 0x3ac   :  { %v925_v49 = vsub.f32 %v902_v46, %v806_v37  ;;  %v934_v53 = vadd.f32 %v926_v32, %v1906_v63  ;;  %v939_v13 = vmax.f32 %v931_v1, 0.0 }
 0x3ad   :  { %v1407_v47 = vpop.f32.mrf.mxu1 }
 0x3ae   :  { %v928_v48 = vsub.f32 %v1407_v47, %v1920_v6  ;;  %v933_v58 = vadd.f32 %v925_v49, %v1906_v63  ;;  %v942_v62 = vmax.f32 %v934_v53, 0.0 }
 0x3af   :  { %v912_v40 = vpop.f32.mrf.mxu1 }
 0x3b0   :  { %v936_v50 = vadd.f32 %v928_v48, %v1906_v63  ;;  %v927_v51 = vsub.f32 %v912_v40, %v812_v36  ;;  %v941_v4 = vmax.f32 %v933_v58, 0.0 }
 0x3b2   :  { %v944_v54 = vmax.f32 %v936_v50, 0.0  ;;  %v935_v56 = vadd.f32 %v927_v51, %v1906_v63 }
 0x3b4   :  { %v943_v59 = vmax.f32 %v935_v56, 0.0  ;;  %1409 = vmatpush3.msra.mxu1 %v944_v54 }
 0x3b5   :  { %1410 = vmatprep.subr.mxu1 %v1462_v27 }
 0x3b6   :  { %1411 = vmatpush3.msra.mxu1 %v943_v59 }
 0x3b7   :  { %1412 = vmatprep.subr.mxu1 %v1462_v27 }
 0x3b8   :  { %1413 = vmatpush3.msra.mxu1 %v942_v62 }
 0x3b9   :  { %1414 = vmatprep.subr.mxu1 %v1462_v27 }
 0x3ba   :  { %1415 = vmatpush3.msra.mxu1 %v941_v4 }
 0x3bb   :  { %1416 = vmatprep.subr.mxu1 %v1462_v27 }
 0x3bc   :  { %1417 = vmatpush3.msra.mxu1 %v940_v10 }
 0x3bd   :  { %1418 = vmatprep.subr.mxu1 %v1462_v27 }
 0x3be   :  { %1419 = vmatpush3.msra.mxu1 %v939_v13 }
 0x3bf   :  { %1420 = vmatprep.subr.mxu1 %v1462_v27 }
 0x3c0   :  { %1421 = vmatpush3.msra.mxu1 %v938_v14 }
 0x3c1   :  { %1422 = vmatprep.subr.mxu1 %v1462_v27 }
 0x3c2   :  { %1423 = vmatpush3.msra.mxu1 %v937_v17 }
 0x3c3   :  { %1425 = vmatmul.mubr.msk.f32.vlgmr.msra.gmra.mxu1 %vm303_vm9, %v1933_v35 }
 0x41c   :  { %v534_v19 = vpop.xlane.xlu1 %533 }
 0x41d   :  { %v535_v5 = vrot.slane %v534_v19, 4 }
 0x41f   :  { %v536_v2 = vmax.f32 %v534_v19, %v535_v5 }
 0x421   :  { %v537_v63 = vrot.slane %v536_v2, 2 }
 0x423   :  { %v538_v20 = vmax.f32 %v536_v2, %v537_v63 }
 0x425   :  { %v539_v21 = vrot.slane %v538_v20, 1 }
 0x427   :  { %v540_v8 = vmax.f32 %v538_v20, %v539_v21 }
 0x429   :  { %1427 = vpush %v540_v8 }
 0x45a   :  { %s1428_s4 = spop %1427 }
 0x45b   :  { %v545_v15 = vstv %s1428_s4 }
 0x45c   :  { %v546_v36 = vmul.f32 %v1080_v33, %v545_v15 }
 0x483   :  { %v1011_v23 = vpop.f32.mrf.mxu1 }
 0x484   :  { %v1015_v3 = vsel %vm531_vm3, %v1011_v23, -inf }
 0x485   :  { %1016 = vmax.xlane.f32.xlu0 %v1015_v3  ;;  %v1426_v6 = vpop.f32.mrf.mxu1 }
 0x50e   :  { %v1017_v25 = vpop.xlane.xlu0 %1016 }
 0x50f   :  { %v1018_v11 = vrot.slane %v1017_v25, 4 }
 0x511   :  { %v1019_v26 = vmax.f32 %v1017_v25, %v1018_v11 }
 0x513   :  { %v1020_v28 = vrot.slane %v1019_v26, 2 }
 0x515   :  { %v1021_v29 = vmax.f32 %v1019_v26, %v1020_v28 }
 0x517   :  { %v1022_v9 = vrot.slane %v1021_v29, 1 }
 0x519   :  { %v1023_v31 = vmax.f32 %v1021_v29, %v1022_v9 }
 0x51b   :  { %1429 = vpush %v1023_v31 }
 0x54c   :  { %s1430_s17 = spop %1429 }
 0x54d   :  { %v1028_v35 = vstv %s1430_s17 }
 0x54e   :  { %v1029_v37 = vmul.f32 %v1146_v34, %v1028_v35 }
 0x550   :  { %v1030_v38 = vadd.f32 %v1029_v37, %v546_v36 }
 0x552   :  { %1032 = vst.msk [vmem:[#allocation3] sm:$0x1] %vm1031_vm6, %v1030_v38 }
 0x553   :  { %1449 = shalt.err (!%p1446_p4)
}
 0x554   :  { %1042 = dma.vmem_to_hbm [thread:$0]  %s1040_s19, 16, %s1992_s6, [#allocation4]  }
 0x555   :  { %1458 = dma.done.wait [#allocation4], 16  }
 0x556   :  { %1459 = vsyncadd [#allocation4], 4294967280 }
 0x557   :  { %1046 = vsyncpa [#allocation4], 1 }

</bundles_post_ra>
